<compile_context>
chip_gen: v6e
topology: v6e:2x2x1
jax: 0.10.0
libtpu: 0.0.40
codegen_flags: <defaults>
</compile_context>

<pallas_src>
import jax
import jax.numpy as jnp
import numpy as np
from jax.experimental import pallas as pl
from jax.experimental.pallas import tpu as pltpu

EPS = 1e-5  # PyTorch LayerNorm default


def _round_up(n, m):
    return (n + m - 1) // m * m


# ----------------------------- kernel ----------------------------------------

def _make_resnet_kernel(bt, lp, hp, h_real):
    """Kernel factory.  bt: batch rows per tile, lp: padded seq len,
    hp: padded hidden (multiple of 128), h_real: true hidden dim."""
    m_rows = bt * lp
    inv_h = 1.0 / float(h_real)

    def _layernorm(v, gamma, beta, lane_mask):
        # v: (M, Hp) f32.  Padded lanes of v are exactly zero, so the full-lane
        # sum divided by the real H is the true mean; the centered values in
        # padded lanes are masked out of the variance.
        mu = jnp.sum(v, axis=-1, keepdims=True) * inv_h
        c = v - mu
        var = jnp.sum(jnp.square(c * lane_mask), axis=-1, keepdims=True) * inv_h
        return c * jax.lax.rsqrt(var + EPS) * gamma + beta

    def _conv3(xm, w_cat, not_first, not_last):
        # xm: (M, Hp) f32, already multiplied by the MaskedConv1d mask.
        # w_cat: (3*Hp, Hp) bf16 = [W_k0 ; W_k1 ; W_k2] stacked on K.
        x_prev = pltpu.roll(xm, 1, axis=0) * not_first           # x[l-1], halo zeroed
        x_next = pltpu.roll(xm, m_rows - 1, axis=0) * not_last   # x[l+1], halo zeroed
        x_cat = jnp.concatenate(
            [x_prev.astype(jnp.bfloat16),
             xm.astype(jnp.bfloat16),
             x_next.astype(jnp.bfloat16)], axis=-1)              # (M, 3*Hp) bf16
        return jnp.dot(x_cat, w_cat, preferred_element_type=jnp.float32)

    def kernel(x_ref, m_ref, nf_ref, nl_ref, w1_ref, w2_ref, ln_ref, o_ref):
        layer = pl.program_id(1)

        # NOTE: o_ref is the resident per-batch-tile carry across the layer
        # axis.  This is only correct because the layer axis is the innermost
        # grid axis and marked "arbitrary"; do not reorder or parallelize it.
        @pl.when(layer == 0)
        def _():
            o_ref[...] = x_ref[...]

        x = o_ref[...]           # (M, Hp) f32 carry
        m = m_ref[...]           # (M, 1)  MaskedConv1d / length-padding mask
        nf = nf_ref[...]         # (M, 1)  0 at the first row of each sequence
        nl = nl_ref[...]         # (M, 1)  0 at the last  row of each sequence

        lane_mask = (jax.lax.broadcasted_iota(jnp.int32, (1, hp), 1)
                     < h_real).astype(jnp.float32)

        ln = ln_ref[0]           # (4, Hp) f32 = [g1, b1, g2, b2]
        g1, b1, g2, b2 = ln[0:1], ln[1:2], ln[2:3], ln[3:4]

        residual = x
        # TODO(synk): activation_fn fixed to ReLU (get_activation_func not modeled).
        t = _conv3(x * m, w1_ref[0], nf, nl)
        t = jnp.maximum(_layernorm(t, g1, b1, lane_mask), 0.0)
        t = _conv3(t * m, w2_ref[0], nf, nl)
        t = _layernorm(t, g2, b2, lane_mask)
        o_ref[...] = jnp.maximum(t + residual, 0.0)

    return kernel


# ----------------------------- wrapper ----------------------------------------

def protein_resnet_blocks(x, params, mask=None, *, b_tile=None):
    """Apply a stack of ProteinResnetBlocks.

    x:    (B, H, L)  float  -- PyTorch Conv1d layout.
    mask: (B, 1, L)  float or None (MaskedConv1d mask).
    params: {"conv1": (layers, H, H, 3), "conv2": (layers, H, H, 3),
             "ln": (layers, 4, H) = [gamma1, beta1, gamma2, beta2]}.
    """
    B, H, L = x.shape
    num_layers = params["conv1"].shape[0]
    Hp = _round_up(H, 128)     # lane-dense channels
    Lp = _round_up(L, 8)       # sublane-aligned sequence
    bt = b_tile if b_tile is not None else B
    assert B % bt == 0, "b_tile must divide the batch"

    # channels-last, padded, flattened to (B*Lp, Hp)
    xcl = jnp.transpose(x, (0, 2, 1)).astype(jnp.float32)          # (B, L, H)
    xcl = jnp.pad(xcl, ((0, 0), (0, Lp - L), (0, Hp - H)))
    x2 = xcl.reshape(B * Lp, Hp)

    # effective conv-input mask: the user mask on real rows, 0 on padded rows
    if mask is None:
        m = jnp.ones((B, L), jnp.float32)
    else:
        m = mask.reshape(B, L).astype(jnp.float32)
    m = jnp.pad(m, ((0, 0), (0, Lp - L))).reshape(B * Lp, 1)

    # halo-row masks for the sequence shifts (shared by every batch row)
    pos = jnp.tile(jnp.arange(Lp, dtype=jnp.int32), B)
    not_first = (pos != 0).astype(jnp.float32)[:, None]            # (B*Lp, 1)
    not_last = (pos != Lp - 1).astype(jnp.float32)[:, None]

    # Conv1d weight (out, in, k) -> stacked (3*Hp, Hp) bf16 with
    # W_k[in, out] = w[out, in, k], so x_cat = [x[l-1] | x[l] | x[l+1]] @ W_cat.
    def stack_w(w):
        w3 = jnp.transpose(w, (0, 3, 2, 1))                        # (layers, 3, in, out)
        w3 = jnp.pad(w3, ((0, 0), (0, 0), (0, Hp - H), (0, Hp - H)))
        return w3.reshape(num_layers, 3 * Hp, Hp).astype(jnp.bfloat16)

    w1 = stack_w(params["conv1"])
    w2 = stack_w(params["conv2"])
    # padded gamma/beta are zero -> padded lanes stay exactly zero after LN
    ln = jnp.pad(params["ln"].astype(jnp.float32), ((0, 0), (0, 0), (0, Hp - H)))

    kernel = _make_resnet_kernel(bt, Lp, Hp, H)
    M = bt * Lp

    out2 = pl.pallas_call(
        kernel,
        out_shape=jax.ShapeDtypeStruct((B * Lp, Hp), jnp.float32),
        grid_spec=pltpu.PrefetchScalarGridSpec(
            num_scalar_prefetch=0,
            # batch-tile axis parallel (keep >=2 tiles per chip on v7x to feed
            # both TensorCores); layer axis innermost + arbitrary (carry).
            grid=(B // bt, num_layers),
            in_specs=[
                pl.BlockSpec((M, Hp), lambda bi, l: (bi, 0)),        # x (resident)
                pl.BlockSpec((M, 1), lambda bi, l: (bi, 0)),         # conv mask
                pl.BlockSpec((M, 1), lambda bi, l: (bi, 0)),         # not_first
                pl.BlockSpec((M, 1), lambda bi, l: (bi, 0)),         # not_last
                pl.BlockSpec((1, 3 * Hp, Hp), lambda bi, l: (l, 0, 0)),  # conv1 w (bf16)
                pl.BlockSpec((1, 3 * Hp, Hp), lambda bi, l: (l, 0, 0)),  # conv2 w (bf16)
                pl.BlockSpec((1, 4, Hp), lambda bi, l: (l, 0, 0)),       # ln params
            ],
            out_specs=pl.BlockSpec((M, Hp), lambda bi, l: (bi, 0)),
        ),
        compiler_params=pltpu.CompilerParams(
            dimension_semantics=("parallel", "arbitrary"),
            vmem_limit_bytes=64 * 1024 * 1024),
    )(x2, m, not_first, not_last, w1, w2, ln)

    out = out2.reshape(B, Lp, Hp)[:, :L, :H]
    return jnp.transpose(out, (0, 2, 1))                            # (B, H, L)


# ----------------------------- reference (plain JAX, f32) ---------------------

def ref_forward(x, params, mask=None):
    # x: (B, H, L); mirrors the PyTorch ProteinResnetBlock stack exactly.
    num_layers = params["conv1"].shape[0]
    L = x.shape[2]

    def masked_conv(v, w, m):
        if m is not None:
            v = v * m
        vp = jnp.pad(v, ((0, 0), (0, 0), (1, 1)))
        return sum(jnp.einsum("oi,bil->bol", w[:, :, k], vp[:, :, k:k + L])
                   for k in range(3))

    def ln(v, g, b):
        vt = jnp.transpose(v, (0, 2, 1))
        mu = jnp.mean(vt, -1, keepdims=True)
        var = jnp.mean((vt - mu) ** 2, -1, keepdims=True)
        vt = (vt - mu) * jax.lax.rsqrt(var + EPS) * g + b
        return jnp.transpose(vt, (0, 2, 1))

    h = x
    for l in range(num_layers):
        w1 = params["conv1"][l]
        w2 = params["conv2"][l]
        g1, b1, g2, b2 = params["ln"][l]
        res = h
        t = masked_conv(h, w1, mask)
        t = jnp.maximum(ln(t, g1, b1), 0.0)
        t = masked_conv(t, w2, mask)
        t = ln(t, g2, b2)
        h = jnp.maximum(t + res, 0.0)
    return h


# ----------------------------- main -------------------------------------------

if __name__ == "__main__":
    B, H, L = 2, 32, 8
    NUM_LAYERS = 2

    key = jax.random.PRNGKey(0)
    kx, kw1, kw2, kg, kb = jax.random.split(key, 5)

    x = jax.random.normal(kx, (B, H, L), jnp.float32)

    # Conv1d: kaiming_normal_(mode='fan_out', relu) -> std = sqrt(2 / (out_ch * k))
    conv_std = (2.0 / (3 * H)) ** 0.5
    conv1_w = conv_std * jax.random.normal(kw1, (NUM_LAYERS, H, H, 3), jnp.float32)
    conv2_w = conv_std * jax.random.normal(kw2, (NUM_LAYERS, H, H, 3), jnp.float32)

    # LayerNorm params (non-trivial to exercise gamma/beta + lane padding)
    gamma = 1.0 + 0.1 * jax.random.normal(kg, (NUM_LAYERS, 2, H), jnp.float32)
    beta = 0.1 * jax.random.normal(kb, (NUM_LAYERS, 2, H), jnp.float32)
    ln_params = jnp.stack(
        [gamma[:, 0], beta[:, 0], gamma[:, 1], beta[:, 1]], axis=1)  # (layers, 4, H)

    # MaskedConv1d mask: zero the trailing 3 positions of batch 1
    mask = jnp.ones((B, 1, L), jnp.float32)
    mask = mask.at[1, 0, L - 3:].set(0.0)

    params = dict(conv1=conv1_w, conv2=conv2_w, ln=ln_params)

    out = protein_resnet_blocks(x, params, mask=mask)
    out = jax.block_until_ready(out)

    ref = ref_forward(x, params, mask=mask)
    np.testing.assert_allclose(np.asarray(out), np.asarray(ref), rtol=2e-2, atol=2e-2)
    print("KERNEL_OK")
</pallas_src>

<mosaic_0001>
module attributes {stable_mosaic.version = 11 : i64} {
  func.func @kernel(%arg0: i32, %arg1: i32, %arg2: memref<16x128xf32, #tpu.memory_space<vmem>>, %arg3: memref<16x1xf32, #tpu.memory_space<vmem>>, %arg4: memref<16x1xf32, #tpu.memory_space<vmem>>, %arg5: memref<16x1xf32, #tpu.memory_space<vmem>>, %arg6: memref<1x384x128xbf16, #tpu.memory_space<vmem>>, %arg7: memref<1x384x128xbf16, #tpu.memory_space<vmem>>, %arg8: memref<1x4x128xf32, #tpu.memory_space<vmem>>, %arg9: memref<16x128xf32, #tpu.memory_space<vmem>>) attributes {dimension_semantics = [#tpu.dimension_semantics<parallel>, #tpu.dimension_semantics<arbitrary>], iteration_bounds = array<i64: 1, 2>, scalar_prefetch = 0 : i64, scratch_operands = 0 : i64, tpu.core_type = #tpu.core_type<tc>, window_params = [{transform_indices = @transform_0, window_bounds = array<i64: 16, 128>}, {transform_indices = @transform_1, window_bounds = array<i64: 16, 1>}, {transform_indices = @transform_2, window_bounds = array<i64: 16, 1>}, {transform_indices = @transform_3, window_bounds = array<i64: 16, 1>}, {transform_indices = @transform_4, window_bounds = array<i64: 1, 384, 128>}, {transform_indices = @transform_5, window_bounds = array<i64: 1, 384, 128>}, {transform_indices = @transform_6, window_bounds = array<i64: 1, 4, 128>}, {transform_indices = @transform_7, window_bounds = array<i64: 16, 128>}]} {
    %c0_i32 = arith.constant 0 : i32
    %0 = arith.cmpi eq, %arg1, %c0_i32 : i32
    %1 = arith.extui %0 : i1 to i32
    %c0_i32_0 = arith.constant 0 : i32
    %2 = arith.cmpi ne, %1, %c0_i32_0 : i32
    scf.if %2 {
      %c0_34 = arith.constant 0 : index
      %c0_35 = arith.constant 0 : index
      %98 = vector.load %arg2[%c0_34, %c0_35] : memref<16x128xf32, #tpu.memory_space<vmem>>, vector<16x128xf32>
      %c0_36 = arith.constant 0 : index
      %c0_37 = arith.constant 0 : index
      %99 = vector.load %arg9[%c0_36, %c0_37] : memref<16x128xf32, #tpu.memory_space<vmem>>, vector<16x128xf32>
      tpu.vector_store %arg9[%c0_36, %c0_37], %98 {strides = array<i32>} : memref<16x128xf32, #tpu.memory_space<vmem>>, vector<16x128xf32>,
    } else {
    }
    %c0 = arith.constant 0 : index
    %c0_1 = arith.constant 0 : index
    %3 = vector.load %arg9[%c0, %c0_1] : memref<16x128xf32, #tpu.memory_space<vmem>>, vector<16x128xf32>
    %c0_2 = arith.constant 0 : index
    %c0_3 = arith.constant 0 : index
    %4 = vector.load %arg3[%c0_2, %c0_3] : memref<16x1xf32, #tpu.memory_space<vmem>>, vector<16x1xf32>
    %c0_4 = arith.constant 0 : index
    %c0_5 = arith.constant 0 : index
    %5 = vector.load %arg4[%c0_4, %c0_5] : memref<16x1xf32, #tpu.memory_space<vmem>>, vector<16x1xf32>
    %c0_6 = arith.constant 0 : index
    %c0_7 = arith.constant 0 : index
    %6 = vector.load %arg5[%c0_6, %c0_7] : memref<16x1xf32, #tpu.memory_space<vmem>>, vector<16x1xf32>
    %7 = tpu.iota {dimensions = array<i32: 1>} : vector<1x128xi32>
    %c32_i32 = arith.constant 32 : i32
    %8 = vector.broadcast %c32_i32 : i32 to vector<1x128xi32>
    %9 = arith.cmpi slt, %7, %8 : vector<1x128xi32>
    %10 = arith.extui %9 : vector<1x128xi1> to vector<1x128xi32>
    %11 = arith.sitofp %10 : vector<1x128xi32> to vector<1x128xf32>
    %c0_8 = arith.constant 0 : index
    %c0_9 = arith.constant 0 : index
    %c0_10 = arith.constant 0 : index
    %12 = vector.load %arg8[%c0_8, %c0_9, %c0_10] : memref<1x4x128xf32, #tpu.memory_space<vmem>>, vector<1x4x128xf32>
    %13 = vector.shape_cast %12 : vector<1x4x128xf32> to vector<4x128xf32>
    %14 = vector.extract_strided_slice %13 {offsets = [0, 0], sizes = [1, 128], strides = [1, 1]} : vector<4x128xf32> to vector<1x128xf32>
    %15 = vector.extract_strided_slice %13 {offsets = [1, 0], sizes = [1, 128], strides = [1, 1]} : vector<4x128xf32> to vector<1x128xf32>
    %16 = vector.extract_strided_slice %13 {offsets = [2, 0], sizes = [1, 128], strides = [1, 1]} : vector<4x128xf32> to vector<1x128xf32>
    %17 = vector.extract_strided_slice %13 {offsets = [3, 0], sizes = [1, 128], strides = [1, 1]} : vector<4x128xf32> to vector<1x128xf32>
    %18 = vector.broadcast %4 : vector<16x1xf32> to vector<16x128xf32>
    %19 = arith.mulf %3, %18 : vector<16x128xf32>
    %c0_11 = arith.constant 0 : index
    %c0_12 = arith.constant 0 : index
    %c0_13 = arith.constant 0 : index
    %20 = vector.load %arg6[%c0_11, %c0_12, %c0_13] : memref<1x384x128xbf16, #tpu.memory_space<vmem>>, vector<1x384x128xbf16>
    %21 = vector.shape_cast %20 : vector<1x384x128xbf16> to vector<384x128xbf16>
    %c1_i32 = arith.constant 1 : i32
    %22 = tpu.dynamic_rotate %19 by %c1_i32 dim 0 : vector<16x128xf32>, i32 -> vector<16x128xf32>
    %23 = vector.broadcast %5 : vector<16x1xf32> to vector<16x128xf32>
    %24 = arith.mulf %22, %23 : vector<16x128xf32>
    %c15_i32 = arith.constant 15 : i32
    %25 = tpu.dynamic_rotate %19 by %c15_i32 dim 0 : vector<16x128xf32>, i32 -> vector<16x128xf32>
    %26 = vector.broadcast %6 : vector<16x1xf32> to vector<16x128xf32>
    %27 = arith.mulf %25, %26 : vector<16x128xf32>
    %28 = arith.truncf %24 : vector<16x128xf32> to vector<16x128xbf16>
    %29 = arith.truncf %19 : vector<16x128xf32> to vector<16x128xbf16>
    %30 = arith.truncf %27 : vector<16x128xf32> to vector<16x128xbf16>
    %31 = tpu.concatenate %28, %29, %30 in 1 : vector<16x128xbf16>, vector<16x128xbf16>, vector<16x128xbf16> -> vector<16x384xbf16>
    %cst = arith.constant dense<0.000000e+00> : vector<16x128xf32>
    %32 = tpu.matmul %31, %21, %cst {dimension_numbers = #tpu.dot_dimension_numbers<[1], [0], [0], [1], [0, 0, 1, 1], [], []>} : vector<16x384xbf16>, vector<384x128xbf16>, vector<16x128xf32> -> vector<16x128xf32>
    %cst_14 = arith.constant dense<0.000000e+00> : vector<16xf32>
    %33 = vector.multi_reduction <add>, %32, %cst_14 [1] : vector<16x128xf32> to vector<16xf32>
    %34 = vector.shape_cast %33 : vector<16xf32> to vector<16x1xf32>
    %cst_15 = arith.constant 3.125000e-02 : f32
    %35 = vector.broadcast %cst_15 : f32 to vector<16x1xf32>
    %36 = arith.mulf %34, %35 : vector<16x1xf32>
    %37 = vector.broadcast %36 : vector<16x1xf32> to vector<16x128xf32>
    %38 = arith.subf %32, %37 : vector<16x128xf32>
    %39 = vector.broadcast %11 : vector<1x128xf32> to vector<16x128xf32>
    %40 = arith.mulf %38, %39 : vector<16x128xf32>
    %41 = arith.mulf %40, %40 : vector<16x128xf32>
    %cst_16 = arith.constant dense<0.000000e+00> : vector<16xf32>
    %42 = vector.multi_reduction <add>, %41, %cst_16 [1] : vector<16x128xf32> to vector<16xf32>
    %43 = vector.shape_cast %42 : vector<16xf32> to vector<16x1xf32>
    %cst_17 = arith.constant 3.125000e-02 : f32
    %44 = vector.broadcast %cst_17 : f32 to vector<16x1xf32>
    %45 = arith.mulf %43, %44 : vector<16x1xf32>
    %cst_18 = arith.constant 9.99999974E-6 : f32
    %46 = vector.broadcast %cst_18 : f32 to vector<16x1xf32>
    %47 = arith.addf %45, %46 : vector<16x1xf32>
    %48 = math.rsqrt %47 : vector<16x1xf32>
    %49 = vector.broadcast %48 : vector<16x1xf32> to vector<16x128xf32>
    %50 = arith.mulf %38, %49 : vector<16x128xf32>
    %51 = vector.broadcast %14 : vector<1x128xf32> to vector<16x128xf32>
    %52 = arith.mulf %50, %51 : vector<16x128xf32>
    %53 = vector.broadcast %15 : vector<1x128xf32> to vector<16x128xf32>
    %54 = arith.addf %52, %53 : vector<16x128xf32>
    %cst_19 = arith.constant 0.000000e+00 : f32
    %55 = vector.broadcast %cst_19 : f32 to vector<16x128xf32>
    %56 = arith.maximumf %54, %55 : vector<16x128xf32>
    %57 = vector.broadcast %4 : vector<16x1xf32> to vector<16x128xf32>
    %58 = arith.mulf %56, %57 : vector<16x128xf32>
    %c0_20 = arith.constant 0 : index
    %c0_21 = arith.constant 0 : index
    %c0_22 = arith.constant 0 : index
    %59 = vector.load %arg7[%c0_20, %c0_21, %c0_22] : memref<1x384x128xbf16, #tpu.memory_space<vmem>>, vector<1x384x128xbf16>
    %60 = vector.shape_cast %59 : vector<1x384x128xbf16> to vector<384x128xbf16>
    %c1_i32_23 = arith.constant 1 : i32
    %61 = tpu.dynamic_rotate %58 by %c1_i32_23 dim 0 : vector<16x128xf32>, i32 -> vector<16x128xf32>
    %62 = vector.broadcast %5 : vector<16x1xf32> to vector<16x128xf32>
    %63 = arith.mulf %61, %62 : vector<16x128xf32>
    %c15_i32_24 = arith.constant 15 : i32
    %64 = tpu.dynamic_rotate %58 by %c15_i32_24 dim 0 : vector<16x128xf32>, i32 -> vector<16x128xf32>
    %65 = vector.broadcast %6 : vector<16x1xf32> to vector<16x128xf32>
    %66 = arith.mulf %64, %65 : vector<16x128xf32>
    %67 = arith.truncf %63 : vector<16x128xf32> to vector<16x128xbf16>
    %68 = arith.truncf %58 : vector<16x128xf32> to vector<16x128xbf16>
    %69 = arith.truncf %66 : vector<16x128xf32> to vector<16x128xbf16>
    %70 = tpu.concatenate %67, %68, %69 in 1 : vector<16x128xbf16>, vector<16x128xbf16>, vector<16x128xbf16> -> vector<16x384xbf16>
    %cst_25 = arith.constant dense<0.000000e+00> : vector<16x128xf32>
    %71 = tpu.matmul %70, %60, %cst_25 {dimension_numbers = #tpu.dot_dimension_numbers<[1], [0], [0], [1], [0, 0, 1, 1], [], []>} : vector<16x384xbf16>, vector<384x128xbf16>, vector<16x128xf32> -> vector<16x128xf32>
    %cst_26 = arith.constant dense<0.000000e+00> : vector<16xf32>
    %72 = vector.multi_reduction <add>, %71, %cst_26 [1] : vector<16x128xf32> to vector<16xf32>
    %73 = vector.shape_cast %72 : vector<16xf32> to vector<16x1xf32>
    %cst_27 = arith.constant 3.125000e-02 : f32
    %74 = vector.broadcast %cst_27 : f32 to vector<16x1xf32>
    %75 = arith.mulf %73, %74 : vector<16x1xf32>
    %76 = vector.broadcast %75 : vector<16x1xf32> to vector<16x128xf32>
    %77 = arith.subf %71, %76 : vector<16x128xf32>
    %78 = vector.broadcast %11 : vector<1x128xf32> to vector<16x128xf32>
    %79 = arith.mulf %77, %78 : vector<16x128xf32>
    %80 = arith.mulf %79, %79 : vector<16x128xf32>
    %cst_28 = arith.constant dense<0.000000e+00> : vector<16xf32>
    %81 = vector.multi_reduction <add>, %80, %cst_28 [1] : vector<16x128xf32> to vector<16xf32>
    %82 = vector.shape_cast %81 : vector<16xf32> to vector<16x1xf32>
    %cst_29 = arith.constant 3.125000e-02 : f32
    %83 = vector.broadcast %cst_29 : f32 to vector<16x1xf32>
    %84 = arith.mulf %82, %83 : vector<16x1xf32>
    %cst_30 = arith.constant 9.99999974E-6 : f32
    %85 = vector.broadcast %cst_30 : f32 to vector<16x1xf32>
    %86 = arith.addf %84, %85 : vector<16x1xf32>
    %87 = math.rsqrt %86 : vector<16x1xf32>
    %88 = vector.broadcast %87 : vector<16x1xf32> to vector<16x128xf32>
    %89 = arith.mulf %77, %88 : vector<16x128xf32>
    %90 = vector.broadcast %16 : vector<1x128xf32> to vector<16x128xf32>
    %91 = arith.mulf %89, %90 : vector<16x128xf32>
    %92 = vector.broadcast %17 : vector<1x128xf32> to vector<16x128xf32>
    %93 = arith.addf %91, %92 : vector<16x128xf32>
    %94 = arith.addf %93, %3 : vector<16x128xf32>
    %cst_31 = arith.constant 0.000000e+00 : f32
    %95 = vector.broadcast %cst_31 : f32 to vector<16x128xf32>
    %96 = arith.maximumf %94, %95 : vector<16x128xf32>
    %c0_32 = arith.constant 0 : index
    %c0_33 = arith.constant 0 : index
    %97 = vector.load %arg9[%c0_32, %c0_33] : memref<16x128xf32, #tpu.memory_space<vmem>>, vector<16x128xf32>
    tpu.vector_store %arg9[%c0_32, %c0_33], %96 {strides = array<i32>} : memref<16x128xf32, #tpu.memory_space<vmem>>, vector<16x128xf32>,
    return
  }
  func.func @transform_0(%arg0: i32, %arg1: i32) -> (i32, i32) {
    %c0_i32 = arith.constant 0 : i32
    %c0_i32_0 = arith.constant 0 : i32
    return %arg0, %c0_i32 : i32, i32
  }
  func.func @transform_1(%arg0: i32, %arg1: i32) -> (i32, i32) {
    %c0_i32 = arith.constant 0 : i32
    %c0_i32_0 = arith.constant 0 : i32
    return %arg0, %c0_i32 : i32, i32
  }
  func.func @transform_2(%arg0: i32, %arg1: i32) -> (i32, i32) {
    %c0_i32 = arith.constant 0 : i32
    %c0_i32_0 = arith.constant 0 : i32
    return %arg0, %c0_i32 : i32, i32
  }
  func.func @transform_3(%arg0: i32, %arg1: i32) -> (i32, i32) {
    %c0_i32 = arith.constant 0 : i32
    %c0_i32_0 = arith.constant 0 : i32
    return %arg0, %c0_i32 : i32, i32
  }
  func.func @transform_4(%arg0: i32, %arg1: i32) -> (i32, i32, i32) {
    %c0_i32 = arith.constant 0 : i32
    %c0_i32_0 = arith.constant 0 : i32
    %c0_i32_1 = arith.constant 0 : i32
    return %arg1, %c0_i32, %c0_i32_0 : i32, i32, i32
  }
  func.func @transform_5(%arg0: i32, %arg1: i32) -> (i32, i32, i32) {
    %c0_i32 = arith.constant 0 : i32
    %c0_i32_0 = arith.constant 0 : i32
    %c0_i32_1 = arith.constant 0 : i32
    return %arg1, %c0_i32, %c0_i32_0 : i32, i32, i32
  }
  func.func @transform_6(%arg0: i32, %arg1: i32) -> (i32, i32, i32) {
    %c0_i32 = arith.constant 0 : i32
    %c0_i32_0 = arith.constant 0 : i32
    %c0_i32_1 = arith.constant 0 : i32
    return %arg1, %c0_i32, %c0_i32_0 : i32, i32, i32
  }
  func.func @transform_7(%arg0: i32, %arg1: i32) -> (i32, i32) {
    %c0_i32 = arith.constant 0 : i32
    %c0_i32_0 = arith.constant 0 : i32
    return %arg0, %c0_i32 : i32, i32
  }
}

</mosaic_0001>

<bundles_post_ra>
// kernel: tpu_custom_call.1
= control target key start
LH: loop header
LB: loop body
LE: loop exit
PB: predicated region body
PF: predicated region fallthrough
CT: control target
= control target key end

     0   :  { %s2145_s0 = inlined_call_operand.vmem [shape: f32[16,128], index: 0, kind: input, shape index: {}]   ;;  %s2146_s1 = inlined_call_operand.vmem [shape: f32[16,1], index: 1, kind: input, shape index: {}]   ;;  %s2147_s2 = inlined_call_operand.vmem [shape: f32[16,1], index: 2, kind: input, shape index: {}]   ;;  %s2148_s3 = inlined_call_operand.vmem [shape: f32[16,1], index: 3, kind: input, shape index: {}]   ;;  %s2149_s4 = inlined_call_operand.hbm [shape: bf16[2,384,128], index: 4, kind: input, shape index: {}]   ;;  %s2150_s5 = inlined_call_operand.hbm [shape: bf16[2,384,128], index: 5, kind: input, shape index: {}]   ;;  %s2151_s6 = inlined_call_operand.vmem [shape: f32[2,4,128], index: 6, kind: input, shape index: {}]   ;;  %s2152_s7 = inlined_call_operand.hbm [shape: f32[16,128], index: 7, kind: output, shape index: {}]  }
   0x1   :  { %2155 = sst [smem:[#allocation12_spill]] %s2149_s4 }
   0x2   :  { %12 = vsyncpa [#allocation3], 0 }
   0x3   :  { %14 = vsyncpa [#allocation3 + $0x1], 0 }
   0x4   :  { %15 = vsyncpa [#allocation6], 0 }
   0x5   :  { %17 = vsyncpa [#allocation6 + $0x1], 0 }
   0x6   :  { %18 = vsyncpa [#allocation4], 0  ;;  %s1829_s24 = smov 0   ;;  %s1831_s25 = smov 0  }
   0x7   :  { %s1833_s26 = smov 0   ;;  %s1835_s27 = smov 0  }
   0x8   :  { %s1837_s28 = smov 0   ;;  %s1839_s29 = smov 0  }
   0x9 LB: > { %s2153_s30 = sadd.s32 4294967295, %s1777_s29   ;;  %s33_s8 = sadd.s32 1, %s1773_s28  ;;  %s1777_s29 = sphi %s1839_s29, %s24_s29   ;;  %s1773_s28 = sphi %s1837_s28, %s2168_s28   ;;  %s1769_s27 = sphi %s1835_s27, %s2167_s27   ;;  %s1765_s26 = sphi %s1833_s26, %s2166_s26   ;;  %s1761_s25 = sphi %s1831_s25, %s2165_s25   ;;  %s1757_s24 = sphi %s1829_s24, %s2164_s24  }
   0xa   : > { %p34_p0 = scmp.ge.s32.totalorder %s33_s8, 2  ;;  %s147_s9 = sadd.s32 1, %s1765_s26 }
   0xb   : > { %p154_p1 = scmp.ne.s32.totalorder %s1765_s26, %s1761_s25  ;;  %p155_p2 = scmp.eq.s32.totalorder %s1777_s29, 0 }
   0xc   : > { %s2170_s8 = smov (%p34_p0, %s33_s8), 0  ;;  %p160_p4 = scmp.ne.s32.totalorder %s1761_s25, %s1757_s24 }
   0xd   : > { %2156 = sst [smem:[#allocation11_spill]] %s2170_s8  ;;  %p156_p3 = por %p155_p2, %p154_p1 }
   0xe   : > { %s144_s10 = ssub.s32 %s1773_s28, %s2170_s8  ;;  %p161_p5 = scmp.eq.s32.totalorder %s2153_s30, 0 }
   0xf   : > { %p145_p6 = scmp.eq.s32.totalorder %s144_s10, 0  ;;  %p1522_p8 = scmp.lt.s32.totalorder %s1777_s29, 2 }
  0x10   : > { %p1870_p7 = por %p161_p5, %p160_p4  ;;  %s1879_s13 = sand.u32 1, %s1765_s26  }
  0x11   : > { %s1876_s12 = scalar_select %p145_p6, %s1765_s26, %s147_s9  }
  0x12   : > { %s1503_s14 = smul.u32 3072, %s1773_s28  ;;  %s2158_s4 = sld [smem:[#allocation12_spill]] }
  0x13   : > { %s1502_s15 = smul.u32 192, %s1879_s13  ;;  %p1888_p9 = pnand %p1522_p8, %p156_p3 }
  0x14   : > { %s299_s22 = scalar_lea.sflag [#allocation3], %s1879_s13  ;;  %s1779_s24 = smov [#allocation2]  }
  0x15   : > { %s302_s20 = scalar_lea.vmem [#allocation2], %s1502_s15  ;;  %p1641_p10 = pneg %p1888_p9 }
  0x16   : > { %s309_s21 = sshll.u32 %s302_s20, 4  ;;  %s1657_s9 = sshll.u32 %s1779_s24, 4  ;;  %s310_s21 = int_to_ptr.vmem [resolvable:$true] %s309_s21  ;;  %s1658_s9 = int_to_ptr.vmem [resolvable:$false] %s1657_s9 }
  0x17   : > { %s1652_s23 = scalar_lea.vmem %s310_s21, 3072  ;;  %s1659_s10 = scalar_lea.vmem %s1658_s9, 6144 }
  0x18   : > { %s308_s18 = scalar_lea.hbm %s2158_s4, %s1503_s14  ;;  %p1653_p11 = scmp.ne.s32.totalorder %s310_s21, %s1652_s23 }
  0x19   : > { %p1660_p0 = scmp.lt.s32.totalorder %s310_s21, %s1658_s9  ;;  %p1661_p1 = scmp.lt.s32.totalorder %s1659_s10, %s1652_s23 }
  0x1a   : > { %p1655_p12 = pnand %p1653_p11, %p1641_p10 }
  0x1b   : > { %p1662_p2 = por %p1661_p1, %p1660_p0 }
  0x1c   : > { %p1656_p13 = pneg %p1655_p12 }
  0x1e   : > { %p1663_p3 = pnand %p1662_p2, %p1656_p13 }
  0x20   : > { %1666 = shalt.err (!%p1663_p3)
}
  0x21   : > { %s1780_s16 = smov 64   ;;  %s1781_s17 = smov 4  }
  0x22   : > { %1518 = dma.hbm_to_vmem [thread:$0]  (!%p1888_p9), %s308_s18, 3072, %s310_s21, %s299_s22, %s1780_s16, %s1780_s16, %s1781_s17  }
  0x23   : > { %p1344_p4 = scmp.ge.s32.totalorder %s1777_s29, 1  ;;  %p345_p5 = scmp.lt.s32.totalorder %s1777_s29, 3 }
  0x24   : > { %s329_s9 = scalar_lea.hbm %s2150_s5, %s1503_s14  ;;  %s323_s10 = scalar_lea.vmem [#allocation5], %s1502_s15 }
  0x25   : > { %p1902_p6 = pnand %p1344_p4, %p345_p5  ;;  %s330_s30 = sshll.u32 %s323_s10, 4  ;;  %s331_s30 = int_to_ptr.vmem [resolvable:$true] %s330_s30 }
  0x26   : > { %s320_s4 = scalar_lea.sflag [#allocation6], %s1879_s13  ;;  %s1680_s8 = scalar_lea.vmem %s331_s30, 3072 }
  0x27   : > { %p1681_p8 = scmp.ne.s32.totalorder %s331_s30, %s1680_s8  ;;  %s1782_s18 = smov [#allocation5]  }
  0x28   : > { %s1685_s21 = sshll.u32 %s1782_s18, 4  ;;  %s1686_s21 = int_to_ptr.vmem [resolvable:$false] %s1685_s21 }
  0x29   : > { %p1683_p11 = pnand %p1681_p8, %p1641_p10  ;;  %s1687_s22 = scalar_lea.vmem %s1686_s21, 6144 }
  0x2a   : > { %p1688_p13 = scmp.lt.s32.totalorder %s331_s30, %s1686_s21  ;;  %p1689_p0 = scmp.lt.s32.totalorder %s1687_s22, %s1680_s8 }
  0x2b   : > { %p1684_p12 = pneg %p1683_p11 }
  0x2c   : > { %p1690_p1 = por %p1689_p0, %p1688_p13 }
  0x2e   : > { %p1691_p2 = pnand %p1690_p1, %p1684_p12 }
  0x30   : > { %1694 = shalt.err (!%p1691_p2)
}
  0x31   : > { %1521 = dma.hbm_to_vmem [thread:$0]  (!%p1888_p9), %s329_s9, 3072, %s331_s30, %s320_s4, %s1780_s16, %s1780_s16, %s1781_s17  }
  0x32   : > { %349 = sbr.rel (%p1902_p6) target bundleno = 1250 (0x4e2), region = 48  ;;  %s351_s13 = sand.u32 (!%p1902_p6), 1, %s1761_s25  }
  0x33   : > { %s1506_s14 = smul.u32 (!%p1902_p6), 192, %s351_s13  ;;  %s352_s15 = scalar_lea.sflag (!%p1902_p6), [#allocation3], %s351_s13 }
  0x35   : > { %s1920_s23 = scalar_lea.vmem (!%p1902_p6), [#allocation2], %s1506_s14 }
  0x37   : > { %1744 = dma.done.wait (%p1870_p7), %s352_s15, 3072  }
  0x38   : > { %1746 = vsyncadd (%p1870_p7), %s352_s15, 4294964224  ;;  %s361_s8 = scalar_lea.sflag [#allocation6], %s351_s13  ;;  %s1926_s24 = scalar_lea.vmem [#allocation5], %s1506_s14 }
  0x39   : > { %1748 = dma.done.wait (%p1870_p7), %s361_s8, 3072  }
  0x3a   : > { %1750 = vsyncadd (%p1870_p7), %s361_s8, 4294964224  ;;  %p443_p9 = scmp.lt.s32.totalorder %s1769_s27, 1  ;;  %p1346_p10 = scmp.ne.s32.totalorder %s1769_s27, 0 }
  0x3c   : > { %s444_s4 = scalar_select %p443_p9, %s1769_s27, 1 }
  0x3d   : > { %452 = sbr.rel (%p1346_p10) target bundleno = 68 (0x44), region = 60 }
  0x3e   : > { %s1345_s30 = sshll.u32 %s444_s4, 2 }
  0x3f   : > { %s1937_s17 = scalar_lea.vmem %s2151_s6, %s1345_s30 }
  0x42   : > { %v453_v0 = vld [vmem:[%s2145_s0] sm:$0xff]  ;;  %v454_v1 = vld [vmem:[%s2145_s0 + $0x8] sm:$0xff] }
  0x43   : > { %455 = vst [vmem:[#allocation7] sm:$0xff] %v453_v0  ;;  %456 = vst [vmem:[#allocation7 + $0x8] sm:$0xff] %v454_v1 }
  0x44 PF: > { %v461_v2 = vld [vmem:[%s2147_s2] sm:$0xff]  ;;  %v1783_v4 = vmov 0   ;;  %v462_v5 = vld [vmem:[%s2147_s2 + $0x8] sm:$0xff]  ;;  %v1583_v7 = vld [vmem:[%s1920_s23 + $0x78] sm:$0xff]   ;;  %v1784_v8 = vmov 0.0   ;;  %vm1785_vm0 = vmmov 0   ;;  %v465_v34 = vlaneseq }
  0x45   : > { %v459_v3 = vld [vmem:[%s2146_s1] sm:$0xff]  ;;  %1582 = vset.pattern.permute.xlu1 %v1783_v4  ;;  %1581 = vset.pattern.permute.xlu0 %v1783_v4  ;;  %v460_v6 = vld [vmem:[%s2146_s1 + $0x8] sm:$0xff]  ;;  %v1584_v9 = vld [vmem:[%s1920_s23 + $0x38] sm:$0xff]  }
  0x46   : > { %540 = vperm.xlu1 %1582, %v461_v2   ;;  %473 = vperm.xlu0 %1581, %v459_v3   ;;  %v1585_v10 = vld [vmem:[%s1920_s23 + $0xb8] sm:$0xff]   ;;  %v464_v11 = vld [vmem:[%s2148_s3 + $0x8] sm:$0xff]  ;;  %v463_v12 = vld [vmem:[%s2148_s3] sm:$0xff]  ;;  %v2009_v40 = vshrl.u32 %v465_v34, 7 }
  0x47   : > { %1462 = vmatprep.subr.bf16.mxu1 %v1784_v8  ;;  %1400 = vmatprep.subr.bf16.mxu0 %v1583_v7  ;;  %v1586_v13 = vld [vmem:[%s1920_s23 + $0x70] sm:$0xff]   ;;  %v1589_v16 = vld [vmem:[%s1920_s23 + $0x68] sm:$0xff]   ;;  %v1592_v19 = vld [vmem:[%s1920_s23 + $0x60] sm:$0xff]  }
  0x48   : > { %1401 = vmatpush3.bf16.msra.mxu0 %v1584_v9  ;;  %v1587_v14 = vld [vmem:[%s1920_s23 + $0x30] sm:$0xff]   ;;  %1463 = vmatpush3.bf16.msra.mxu1 %v1585_v10  ;;  %v1590_v17 = vld [vmem:[%s1920_s23 + $0x28] sm:$0xff]   ;;  %v1593_v20 = vld [vmem:[%s1920_s23 + $0x20] sm:$0xff]   ;;  %vm552_vm1 = vcmp.lt.s32.totalorder %v2009_v40, 7  ;;  %vm535_vm2 = vcmp.lt.s32.totalorder %v2009_v40, 1  ;;  %v466_v10 = vand.u32 127, %v465_v34 }
  0x49   : > { %1402 = vmatprep.subr.bf16.mxu0 %v1586_v13  ;;  %v1588_v15 = vld [vmem:[%s1920_s23 + $0xb0] sm:$0xff]   ;;  %1464 = vmatprep.subr.bf16.mxu1 %v1784_v8  ;;  %v1591_v18 = vld [vmem:[%s1920_s23 + $0xa8] sm:$0xff]   ;;  %v1595_v21 = vld [vmem:[%s1920_s23 + $0x58] sm:$0xff]  }
  0x4a   : > { %545 = vperm.xlu1 %1582, %v462_v5   ;;  %478 = vperm.xlu0 %1581, %v460_v6   ;;  %v1594_v22 = vld [vmem:[%s1920_s23 + $0xa0] sm:$0xff]   ;;  %v1596_v23 = vld [vmem:[%s1920_s23 + $0x18] sm:$0xff]   ;;  %v1598_v24 = vld [vmem:[%s1920_s23 + $0x50] sm:$0xff]   ;;  %vm467_vm3 = vcmp.lt.s32.totalorder %v466_v10, 32 }
  0x4b   : > { %1478 = vmatprep.mubr.msk.bf16.mxu1 %vm1785_vm0, %v1784_v8  ;;  %v1597_v25 = vld [vmem:[%s1920_s23 + $0x98] sm:$0xff]   ;;  %v1599_v26 = vld [vmem:[%s1920_s23 + $0x10] sm:$0xff]   ;;  %v1601_v27 = vld [vmem:[%s1920_s23 + $0x48] sm:$0xff]   ;;  %v2038_v13 = vsel %vm467_vm3, 1.0, %v1784_v8 }
  0x4c   : > { %1403 = vmatpush3.bf16.msra.mxu0 %v1587_v14  ;;  %1465 = vmatpush3.bf16.msra.mxu1 %v1588_v15  ;;  %v1600_v28 = vld [vmem:[%s1920_s23 + $0x90] sm:$0xff]   ;;  %v1602_v29 = vld [vmem:[%s1920_s23 + $0x8] sm:$0xff]   ;;  %v1604_v31 = vld [vmem:[%s1920_s23 + $0x40] sm:$0xff]  }
  0x4d   : > { %1404 = vmatprep.subr.bf16.mxu0 %v1589_v16  ;;  %1466 = vmatprep.subr.bf16.mxu1 %v1784_v8  ;;  %v1603_v30 = vld [vmem:[%s1920_s23 + $0x88] sm:$0xff]   ;;  %v1605_v32 = vld [vmem:[%s1920_s23] sm:$0xff]   ;;  %v1619_v34 = vld [vmem:[%s1926_s24 + $0x58] sm:$0xff]  }
  0x4e   : > { %562 = vperm.xlu1 %1582, %v464_v11   ;;  %557 = vperm.xlu0 %1581, %v463_v12   ;;  %v1606_v33 = vld [vmem:[%s1920_s23 + $0x80] sm:$0xff]   ;;  %v2007_v39 = vld [vmem:[#allocation7 + $0x8] sm:$0xff]  ;;  %s1786_s23 = smov [#allocation7]  }
  0x4f   : > { %v1999_v35 = vld [vmem:[#allocation7] sm:$0xff] }
  0x50   : > { %1405 = vmatpush3.bf16.msra.mxu0 %v1590_v17  ;;  %1467 = vmatpush3.bf16.msra.mxu1 %v1591_v18 }
  0x51   : > { %1406 = vmatprep.subr.bf16.mxu0 %v1592_v19  ;;  %1468 = vmatprep.subr.bf16.mxu1 %v1784_v8 }
  0x54   : > { %1407 = vmatpush3.bf16.msra.mxu0 %v1593_v20  ;;  %1469 = vmatpush3.bf16.msra.mxu1 %v1594_v22  ;;  %v1607_v22 = vld [vmem:[%s1926_s24 + $0x78] sm:$0xff]  }
  0x55   : > { %1408 = vmatprep.subr.bf16.mxu0 %v1595_v21  ;;  %1470 = vmatprep.subr.bf16.mxu1 %v1784_v8 }
  0x58   : > { %1409 = vmatpush3.bf16.msra.mxu0 %v1596_v23  ;;  %1471 = vmatpush3.bf16.msra.mxu1 %v1597_v25  ;;  %v1608_v23 = vld [vmem:[%s1926_s24 + $0x38] sm:$0xff]   ;;  %v1610_v25 = vld [vmem:[%s1926_s24 + $0x70] sm:$0xff]  }
  0x59   : > { %1410 = vmatprep.subr.bf16.mxu0 %v1598_v24  ;;  %1472 = vmatprep.subr.bf16.mxu1 %v1784_v8  ;;  %v1609_v24 = vld [vmem:[%s1926_s24 + $0xb8] sm:$0xff]  }
  0x5c   : > { %1411 = vmatpush3.bf16.msra.mxu0 %v1599_v26  ;;  %1473 = vmatpush3.bf16.msra.mxu1 %v1600_v28  ;;  %v1611_v26 = vld [vmem:[%s1926_s24 + $0x30] sm:$0xff]   ;;  %v1613_v28 = vld [vmem:[%s1926_s24 + $0x68] sm:$0xff]  }
  0x5d   : > { %1412 = vmatprep.subr.bf16.mxu0 %v1601_v27  ;;  %1474 = vmatprep.subr.bf16.mxu1 %v1784_v8  ;;  %v1612_v27 = vld [vmem:[%s1926_s24 + $0xb0] sm:$0xff]  }
  0x60   : > { %1413 = vmatpush3.bf16.msra.mxu0 %v1602_v29  ;;  %1475 = vmatpush3.bf16.msra.mxu1 %v1603_v30  ;;  %v1614_v29 = vld [vmem:[%s1926_s24 + $0x28] sm:$0xff]  }
  0x61   : > { %1414 = vmatprep.subr.bf16.mxu0 %v1604_v31  ;;  %1476 = vmatprep.subr.bf16.mxu1 %v1784_v8  ;;  %v1615_v30 = vld [vmem:[%s1926_s24 + $0xa8] sm:$0xff]   ;;  %v1616_v31 = vld [vmem:[%s1926_s24 + $0x60] sm:$0xff]  }
  0x64   : > { %1415 = vmatpush3.bf16.msra.mxu0 %v1605_v32  ;;  %1477 = vmatpush3.bf16.msra.mxu1 %v1606_v33  ;;  %v1617_v32 = vld [vmem:[%s1926_s24 + $0x20] sm:$0xff]  }
  0x65   : > { %1482 = vmatprep.subr.bf16.mxu1 %v1784_v8  ;;  %1431 = vmatprep.subr.bf16.mxu0 %v1607_v22  ;;  %v1618_v33 = vld [vmem:[%s1926_s24 + $0xa0] sm:$0xff]  }
  0xc1   : > { %v2001_v36 = vpop.permute.xlu1 %540  ;;  %v2003_v37 = vpop.permute.xlu0 %473 }
  0xc2   : > { %v481_v38 = vmul.f32 %v2003_v37, %v1999_v35 }
  0xc4   : > { %v531_v44 = vrot.slane %v481_v38, 7  ;;  %v550_v45 = vrot.slane %v481_v38, 1 }
  0xc5   : > { %v2011_v41 = vpop.permute.xlu1 %545  ;;  %v2013_v42 = vpop.permute.xlu0 %478 }
  0xc6   : > { %v482_v43 = vmul.f32 %v2013_v42, %v2007_v39 }
  0xc8   : > { %v532_v46 = vrot.slane %v482_v43, 7  ;;  %v551_v47 = vrot.slane %v482_v43, 1  ;;  %v568_v48 = vpack.c.bf16 %v482_v43, %v481_v38  ;;  %v1620_v38 = vld [vmem:[%s1926_s24 + $0x18] sm:$0xff]  }
  0xc9   : > { %v2019_v49 = vpop.permute.xlu1 %562  ;;  %v2021_v50 = vpop.permute.xlu0 %557  ;;  %v1621_v43 = vld [vmem:[%s1926_s24 + $0x98] sm:$0xff]  }
  0xca   : > { %v554_v51 = vsel %vm552_vm1, %v551_v47, %v550_v45  ;;  %v553_v52 = vsel %vm552_vm1, %v550_v45, %v551_v47  ;;  %746 = vmatprep.mubr.bf16.mxu0 %v568_v48  ;;  %v536_v53 = vsel %vm535_vm2, %v531_v44, %v532_v46  ;;  %v537_v54 = vsel %vm535_vm2, %v532_v46, %v531_v44  ;;  %v1622_v44 = vld [vmem:[%s1926_s24 + $0x50] sm:$0xff]   ;;  %v1625_v47 = vld [vmem:[%s1926_s24 + $0x48] sm:$0xff]  }
  0xcb   : > { %v566_v55 = vmul.f32 %v2019_v49, %v554_v51  ;;  %v565_v56 = vmul.f32 %v2021_v50, %v553_v52  ;;  %v548_v57 = vmul.f32 %v2001_v36, %v537_v54  ;;  %v549_v58 = vmul.f32 %v2011_v41, %v536_v53  ;;  %v1623_v45 = vld [vmem:[%s1926_s24 + $0x10] sm:$0xff]   ;;  %v1626_v48 = vld [vmem:[%s1926_s24 + $0x8] sm:$0xff]   ;;  %v1628_v52 = vld [vmem:[%s1926_s24 + $0x40] sm:$0xff]  }
  0xcc   : > { %v1624_v46 = vld [vmem:[%s1926_s24 + $0x90] sm:$0xff]   ;;  %v1627_v51 = vld [vmem:[%s1926_s24 + $0x88] sm:$0xff]   ;;  %v1629_v53 = vld [vmem:[%s1926_s24] sm:$0xff]  }
  0xcd   : > { %v569_v59 = vpack.c.bf16 %v566_v55, %v565_v56  ;;  %v567_v60 = vpack.c.bf16 %v549_v58, %v548_v57  ;;  %v1630_v54 = vld [vmem:[%s1926_s24 + $0x80] sm:$0xff]   ;;  %s1176_s24 = sshll.u32 %s1786_s23, 4  ;;  %s1177_s24 = int_to_ptr.vmem [resolvable:$true] %s1176_s24 }
  0xce   : > { %s1695_s9 = scalar_lea.vmem %s1177_s24, 256  ;;  %p1702_p6 = scmp.lt.s32.totalorder %s1177_s24, %s1177_s24 }
  0xcf   : > { %747 = vmatmul.mubr.bf16.vlgmr.msra.gmra.mxu0 %v567_v60  ;;  %1479 = vmatmul.mubr.bf16.vlgmr.msra.gmra.mxu1 %v569_v59  ;;  %p1696_p3 = scmp.ne.s32.totalorder %s1177_s24, %s1695_s9  ;;  %p1703_p8 = scmp.lt.s32.totalorder %s1695_s9, %s1695_s9 }
  0xd0   : > { %1498 = vmatprep.mubr.msk.bf16.mxu1 %vm1785_vm0, %v1784_v8  ;;  %1432 = vmatpush3.bf16.msra.mxu0 %v1608_v23 }
  0xd1   : > { %1483 = vmatpush3.bf16.msra.mxu1 %v1609_v24  ;;  %1433 = vmatprep.subr.bf16.mxu0 %v1610_v25  ;;  %p1704_p11 = por %p1703_p8, %p1702_p6 }
  0xd2   : > { %1484 = vmatprep.subr.bf16.mxu1 %v1784_v8 }
  0xd4   : > { %1434 = vmatpush3.bf16.msra.mxu0 %v1611_v26 }
  0xd5   : > { %1485 = vmatpush3.bf16.msra.mxu1 %v1612_v27  ;;  %1435 = vmatprep.subr.bf16.mxu0 %v1613_v28 }
  0xd6   : > { %1486 = vmatprep.subr.bf16.mxu1 %v1784_v8 }
  0xd8   : > { %1436 = vmatpush3.bf16.msra.mxu0 %v1614_v29 }
  0xd9   : > { %1487 = vmatpush3.bf16.msra.mxu1 %v1615_v30  ;;  %1437 = vmatprep.subr.bf16.mxu0 %v1616_v31 }
  0xda   : > { %1488 = vmatprep.subr.bf16.mxu1 %v1784_v8 }
  0xdc   : > { %1438 = vmatpush3.bf16.msra.mxu0 %v1617_v32 }
  0xdd   : > { %1489 = vmatpush3.bf16.msra.mxu1 %v1618_v33  ;;  %1439 = vmatprep.subr.bf16.mxu0 %v1619_v34 }
  0xde   : > { %1490 = vmatprep.subr.bf16.mxu1 %v1784_v8 }
  0xe0   : > { %1440 = vmatpush3.bf16.msra.mxu0 %v1620_v38 }
  0xe1   : > { %1491 = vmatpush3.bf16.msra.mxu1 %v1621_v43  ;;  %1441 = vmatprep.subr.bf16.mxu0 %v1622_v44 }
  0xe2   : > { %1492 = vmatprep.subr.bf16.mxu1 %v1784_v8 }
  0xe4   : > { %1442 = vmatpush3.bf16.msra.mxu0 %v1623_v45 }
  0xe5   : > { %1493 = vmatpush3.bf16.msra.mxu1 %v1624_v46  ;;  %1443 = vmatprep.subr.bf16.mxu0 %v1625_v47 }
  0xe6   : > { %1494 = vmatprep.subr.bf16.mxu1 %v1784_v8 }
  0xe8   : > { %1444 = vmatpush3.bf16.msra.mxu0 %v1626_v48 }
  0xe9   : > { %1495 = vmatpush3.bf16.msra.mxu1 %v1627_v51  ;;  %1445 = vmatprep.subr.bf16.mxu0 %v1628_v52 }
  0xea   : > { %1496 = vmatprep.subr.bf16.mxu1 %v1784_v8 }
  0xec   : > { %1446 = vmatpush3.bf16.msra.mxu0 %v1629_v53 }
  0xed   : > { %1497 = vmatpush3.bf16.msra.mxu1 %v1630_v54 }
 0x18f   : > { %v1416_v61 = vpop.f32.mrf.mxu0  ;;  %v789_v62 = vpop.f32.mrf.mxu1 }
 0x191   : > { %v1417_v63 = vpop.f32.mrf.mxu0  ;;  %v1480_v0 = vpop.f32.mrf.mxu1 }
 0x192   : > { %v1418_v1 = vadd.f32 %v1417_v63, %v1416_v61  ;;  %v822_v61 = vsub.s32 0, %v2009_v40  ;;  %v828_v63 = vsub.s32 1, %v2009_v40 }
 0x193   : > { %v1419_v2 = vpop.f32.mrf.mxu0  ;;  %v792_v3 = vpop.f32.mrf.mxu1 }
 0x194   : > { %v790_v4 = vadd.f32 %v1418_v1, %v789_v62  ;;  %v2081_v62 = vld [vmem:[%s1937_s17] sm:$0xf]  ;;  %s2161_s17 = sadd.s32 4294967295, %s1777_s29  }
 0x195   : > { %v1420_v5 = vpop.f32.mrf.mxu0  ;;  %v1481_v6 = vpop.f32.mrf.mxu1  ;;  %v823_v8 = vrot.slane %v2081_v62, %v822_v61  ;;  %v1151_v61 = vsub.s32 2, %v2009_v40  ;;  %p2112_p7 = scmp.eq.s32.totalorder %s2161_s17, 1 }
 0x196   : > { %v1421_v7 = vadd.f32 %v1420_v5, %v1419_v2  ;;  %796 = vadd.xlane.f32.xlu0 %v790_v4  ;;  %v829_v2 = vrot.slane %v2081_v62, %v828_v63  ;;  %v1157_v63 = vsub.s32 3, %v2009_v40 }
 0x197   : > { %p1697_p4 = pnand %p1696_p3, %p2112_p7 }
 0x198   : > { %v793_v9 = vadd.f32 %v1421_v7, %v792_v3 }
 0x199   : > { %p1698_p5 = pneg %p1697_p4 }
 0x19a   : > { %798 = vadd.xlane.f32.xlu1 %v793_v9 }
 0x19b   : > { %p1705_p12 = pnand %p1704_p11, %p1698_p5 }
 0x21f   : > { %v797_v11 = vpop.xlane.xlu0 %796 }
 0x220   : > { %v800_v12 = vmul.f32 0.03125, %v797_v11 }
 0x222   : > { %v2040_v14 = vsub.f32 %v790_v4, %v800_v12 }
 0x223   : > { %v799_v15 = vpop.xlane.xlu1 %798 }
 0x224   : > { %v801_v16 = vmul.f32 0.03125, %v799_v15  ;;  %v804_v17 = vmul.f32 %v2038_v13, %v2040_v14 }
 0x226   : > { %v2044_v18 = vsub.f32 %v793_v9, %v801_v16  ;;  %v806_v19 = vmul.f32 %v804_v17, %v804_v17 }
 0x228   : > { %808 = vadd.xlane.f32.xlu0 %v806_v19  ;;  %v805_v20 = vmul.f32 %v2038_v13, %v2044_v18 }
 0x22a   : > { %v807_v21 = vmul.f32 %v805_v20, %v805_v20 }
 0x22c   : > { %810 = vadd.xlane.f32.xlu0 %v807_v21 }
 0x2b1   : > { %v809_v55 = vpop.xlane.xlu0 %808 }
 0x2b2   : > { %v812_v56 = vmul.f32 0.03125, %v809_v55 }
 0x2b4   : > { %v814_v57 = vadd.f32 1e-05, %v812_v56 }
 0x2b5   : > { %v811_v58 = vpop.xlane.xlu0 %810 }
 0x2b6   : > { %1631 = vrsqrt.f32 %v814_v57  ;;  %v813_v59 = vmul.f32 0.03125, %v811_v58 }
 0x2b8   : > { %v815_v60 = vadd.f32 1e-05, %v813_v59 }
 0x2ba   : > { %1633 = vrsqrt.f32 %v815_v60 }
 0x2c3   : > { %v1632_v0 = vpop.eup %1631 }
 0x2c4   : > { %v818_v1 = vmul.f32 %v1632_v0, %v2040_v14 }
 0x2c6   : > { %v824_v3 = vmul.f32 %v823_v8, %v818_v1 }
 0x2c7   : > { %v1634_v4 = vpop.eup %1633 }
 0x2c8   : > { %v819_v5 = vmul.f32 %v1634_v4, %v2044_v18  ;;  %v830_v6 = vadd.f32 %v829_v2, %v824_v3 }
 0x2ca   : > { %v825_v7 = vmul.f32 %v823_v8, %v819_v5  ;;  %v832_v9 = vmax.f32 %v830_v6, 0.0  ;;  %v1152_v8 = vrot.slane %v2081_v62, %v1151_v61 }
 0x2cc   : > { %v831_v10 = vadd.f32 %v829_v2, %v825_v7  ;;  %v834_v11 = vmul.f32 %v832_v9, %v2003_v37 }
 0x2ce   : > { %v833_v12 = vmax.f32 %v831_v10, 0.0  ;;  %v884_v16 = vrot.slane %v834_v11, 7  ;;  %v890_v19 = vrot.slane %v834_v11, 1 }
 0x2d0   : > { %v835_v15 = vmul.f32 %v833_v12, %v2013_v42 }
 0x2d2   : > { %v885_v17 = vrot.slane %v835_v15, 7  ;;  %v891_v20 = vrot.slane %v835_v15, 1  ;;  %v897_v14 = vpack.c.bf16 %v835_v15, %v834_v11 }
 0x2d4   : > { %1075 = vmatprep.mubr.bf16.mxu0 %v897_v14  ;;  %v886_v21 = vsel %vm535_vm2, %v884_v16, %v885_v17  ;;  %v887_v18 = vsel %vm535_vm2, %v885_v17, %v884_v16  ;;  %v892_v22 = vsel %vm552_vm1, %v890_v19, %v891_v20  ;;  %v893_v37 = vsel %vm552_vm1, %v891_v20, %v890_v19 }
 0x2d5   : > { %v888_v42 = vmul.f32 %v887_v18, %v2001_v36  ;;  %v889_v23 = vmul.f32 %v886_v21, %v2011_v41  ;;  %v894_v24 = vmul.f32 %v892_v22, %v2021_v50  ;;  %v895_v25 = vmul.f32 %v893_v37, %v2019_v49 }
 0x2d7   : > { %v896_v26 = vpack.c.bf16 %v889_v23, %v888_v42  ;;  %v898_v27 = vpack.c.bf16 %v895_v25, %v894_v24 }
 0x2d9   : > { %1076 = vmatmul.mubr.bf16.vlgmr.msra.gmra.mxu0 %v896_v26  ;;  %1499 = vmatmul.mubr.bf16.vlgmr.msra.gmra.mxu1 %v898_v27 }
 0x399   : > { %v1447_v28 = vpop.f32.mrf.mxu0  ;;  %v1118_v29 = vpop.f32.mrf.mxu1 }
 0x39b   : > { %v1448_v30 = vpop.f32.mrf.mxu0  ;;  %v1500_v31 = vpop.f32.mrf.mxu1 }
 0x39c   : > { %v1449_v32 = vadd.f32 %v1448_v30, %v1447_v28 }
 0x39d   : > { %v1450_v33 = vpop.f32.mrf.mxu0  ;;  %v1121_v34 = vpop.f32.mrf.mxu1 }
 0x39e   : > { %v1119_v38 = vadd.f32 %v1449_v32, %v1118_v29 }
 0x39f   : > { %v1451_v43 = vpop.f32.mrf.mxu0  ;;  %v1501_v36 = vpop.f32.mrf.mxu1 }
 0x3a0   : > { %v1452_v44 = vadd.f32 %v1451_v43, %v1450_v33  ;;  %1125 = vadd.xlane.f32.xlu1 %v1119_v38 }
 0x3a2   : > { %v1122_v41 = vadd.f32 %v1452_v44, %v1121_v34 }
 0x3a4   : > { %1127 = vadd.xlane.f32.xlu0 %v1122_v41 }
 0x429   : > { %v1126_v50 = vpop.xlane.xlu1 %1125 }
 0x42a   : > { %v1129_v49 = vmul.f32 0.03125, %v1126_v50 }
 0x42c   : > { %v1131_v45 = vsub.f32 %v1119_v38, %v1129_v49 }
 0x42d   : > { %v1128_v46 = vpop.xlane.xlu0 %1127 }
 0x42e   : > { %v1130_v47 = vmul.f32 0.03125, %v1128_v46  ;;  %v1133_v48 = vmul.f32 %v2038_v13, %v1131_v45 }
 0x430   : > { %v1132_v51 = vsub.f32 %v1122_v41, %v1130_v47  ;;  %v1135_v52 = vmul.f32 %v1133_v48, %v1133_v48 }
 0x432   : > { %1137 = vadd.xlane.f32.xlu1 %v1135_v52  ;;  %v1134_v53 = vmul.f32 %v2038_v13, %v1132_v51  ;;  %v1158_v13 = vrot.slane %v2081_v62, %v1157_v63 }
 0x434   : > { %v1136_v54 = vmul.f32 %v1134_v53, %v1134_v53 }
 0x436   : > { %1139 = vadd.xlane.f32.xlu0 %v1136_v54 }
 0x4bb   : > { %v1138_v55 = vpop.xlane.xlu1 %1137 }
 0x4bc   : > { %v1141_v56 = vmul.f32 0.03125, %v1138_v55 }
 0x4be   : > { %v1143_v57 = vadd.f32 1e-05, %v1141_v56 }
 0x4bf   : > { %v1140_v58 = vpop.xlane.xlu0 %1139 }
 0x4c0   : > { %1635 = vrsqrt.f32 %v1143_v57  ;;  %v1142_v59 = vmul.f32 0.03125, %v1140_v58 }
 0x4c2   : > { %v1144_v60 = vadd.f32 1e-05, %v1142_v59 }
 0x4c4   : > { %1637 = vrsqrt.f32 %v1144_v60 }
 0x4cd   : > { %v1636_v0 = vpop.eup %1635 }
 0x4ce   : > { %v1147_v1 = vmul.f32 %v1636_v0, %v1131_v45 }
 0x4d0   : > { %v1153_v2 = vmul.f32 %v1152_v8, %v1147_v1 }
 0x4d1   : > { %v1638_v3 = vpop.eup %1637 }
 0x4d2   : > { %v1148_v4 = vmul.f32 %v1638_v3, %v1132_v51  ;;  %v1159_v5 = vadd.f32 %v1158_v13, %v1153_v2 }
 0x4d4   : > { %v1154_v6 = vmul.f32 %v1152_v8, %v1148_v4  ;;  %v1161_v7 = vadd.f32 %v1159_v5, %v1999_v35 }
 0x4d6   : > { %v1160_v9 = vadd.f32 %v1158_v13, %v1154_v6  ;;  %v1163_v10 = vmax.f32 %v1161_v7, 0.0 }
 0x4d8   : > { %v1162_v40 = vadd.f32 %v1160_v9, %v2007_v39  ;;  %1165 = vst [vmem:[#allocation7] sm:$0xff] %v1163_v10 }
 0x4da   : > { %v1164_v62 = vmax.f32 %v1162_v40, 0.0 }
 0x4dc   : > { %1166 = vst [vmem:[#allocation7 + $0x8] sm:$0xff] %v1164_v62 }
 0x4dd   : > { %1708 = shalt.err (!%p1705_p12)
}
 0x4de   : > { %s1787_s10 = smov 128   ;;  %s1788_s11 = smov 8  }
 0x4df   : > { %1512 = dma.vmem_to_hbm [thread:$0]  (%p2112_p7), %s1177_s24, 256, %s2152_s7, [#allocation4], %s1787_s10, %s1787_s10, %s1788_s11  }
 0x4e0   : > { %1752 = dma.done.wait (%p2112_p7), [#allocation4], 256  }
 0x4e1   : > { %1754 = vsyncadd (%p2112_p7), [#allocation4], 4294967040 }
 0x4e2 PF: > { %s24_s29 = sadd.s32 1, %s1777_s29   ;;  %s2163_s22 = sld [smem:[#allocation11_spill]] }
 0x4e3   : > { %p21_p13 = scmp.ge.s32.totalorder %s24_s29, 4   ;;  %s2164_s24 = smov %s1761_s25 }
 0x4e4   : > { %s2165_s25 = smov %s1765_s26  ;;  %s2166_s26 = smov %s1876_s12 }
 0x4e5   : > { %s2167_s27 = smov %s1773_s28  ;;  %23 = sbr.rel (!%p21_p13) target bundleno = 9 (0x9), region = 118 }
 0x4e8   : > { %s2168_s28 = smov %s2163_s22 }
 0x4ea   :  { %1192 = vsyncpa [#allocation3], 1 }
 0x4eb   :  { %1194 = vsyncpa [#allocation3 + $0x1], 1 }
 0x4ec   :  { %1195 = vsyncpa [#allocation6], 1 }
 0x4ed   :  { %1197 = vsyncpa [#allocation6 + $0x1], 1 }
 0x4ee   :  { %1198 = vsyncpa [#allocation4], 1 }
 0x4ef   :  { %1200 = vsyncpa [#allocation4 + $0x1], 1 }

</bundles_post_ra>
